<compile_context>
chip_gen: v5e
topology: v5e:2x2
jax: 0.10.0
libtpu: 0.0.40
codegen_flags: <defaults>
</compile_context>

<pallas_src>
import functools

import jax
import jax.numpy as jnp
import numpy as np
from jax.experimental import pallas as pl
from jax.experimental.pallas import tpu as pltpu

LANE = 128
SUBLANE = 8


def _round_up(x: int, m: int) -> int:
    return ((x + m - 1) // m) * m


def _cdiv(a: int, b: int) -> int:
    return -(-a // b)


# --------------------------------------------------------------------------
# Pallas kernel: fused 2-layer MLP body (Linear+ReLU twice) + mean head.
# Operates on one (TM, *) batch tile per grid step; weights are resident.
# --------------------------------------------------------------------------
def _policy_fwd_kernel(obs_ref, w1_ref, b1_ref, w2_ref, b2_ref,
                       wm_ref, bm_ref, *out_refs, return_h):
    if return_h:
        mean_ref, h_ref = out_refs
    else:
        (mean_ref,) = out_refs
        h_ref = None

    x = obs_ref[...]

    # Layer 1: (TM, obs_dim) @ (obs_dim, H1) -- MXU, f32 accumulate.
    h1 = jnp.dot(x.astype(w1_ref.dtype), w1_ref[...],
                 preferred_element_type=jnp.float32)
    h1 = jnp.maximum(h1 + b1_ref[...], 0.0)          # bias+ReLU in f32 (VPU)

    # Layer 2: (TM, H1) @ (H1, H2)
    h2 = jnp.dot(h1.astype(w2_ref.dtype), w2_ref[...],
                 preferred_element_type=jnp.float32)
    h2 = jnp.maximum(h2 + b2_ref[...], 0.0)

    if h_ref is not None:
        h_ref[...] = h2.astype(h_ref.dtype)

    # Mean head: narrow (TM, act_dim) store (act_dim == full array last dim).
    mean = jnp.dot(h2.astype(wm_ref.dtype), wm_ref[...],
                   preferred_element_type=jnp.float32)
    mean_ref[...] = (mean + bm_ref[...]).astype(mean_ref.dtype)


def gaussian_policy_forward(obs, params, *, block_rows=1024, return_h=True,
                            weights_dtype=jnp.bfloat16, h_dtype=jnp.float32,
                            min_grid_steps=1):
    """Returns (mean, std[, h]) — the parameters of Normal(mean, std) plus the
    body features h, matching GaussianPolicy.forward semantics.

    weights_dtype: MXU operand dtype for the matmuls (f32 accumulation and f32
      bias/ReLU regardless).  Default bf16; pass jnp.float32 for exact parity.
    h_dtype: storage dtype for h (bf16 halves the dominant HBM writeback).
    min_grid_steps: set >= 2 on v7x so the "parallel" batch axis can be split
      across both TensorCores.
    """
    w1, b1, w2, b2, wm, bm, log_std = (
        params["w1"], params["b1"], params["w2"], params["b2"],
        params["wm"], params["bm"], params["log_std"],
    )
    orig_B, obs_dim = obs.shape
    h1_dim = w1.shape[1]
    h2_dim = w2.shape[1]
    act_dim = wm.shape[1]

    if weights_dtype is not None:
        w1 = w1.astype(weights_dtype)
        w2 = w2.astype(weights_dtype)
        wm = wm.astype(weights_dtype)
    # Biases stay f32: bias-add/ReLU run on the VPU in f32 (v5e has no bf16 VPU).

    # Batch tiling: tm is a multiple of SUBLANE and <= B, so only the last grid
    # step can be ragged; Pallas masks its out-of-range output rows.  No batch
    # padding and no output slicing => no extra HBM copies.
    if orig_B < SUBLANE:
        obs = jnp.pad(obs, ((0, SUBLANE - orig_B), (0, 0)))
    B = obs.shape[0]
    steps = max(int(min_grid_steps), _cdiv(B, max(int(block_rows), 1)))
    tm = _round_up(_cdiv(B, steps), SUBLANE)
    tm = max(SUBLANE, min(tm, (B // SUBLANE) * SUBLANE))
    grid = (_cdiv(B, tm),)

    def tile_spec(cols):
        return pl.BlockSpec((tm, cols), lambda i: (i, 0))

    def resident_spec(rows, cols):
        # Constant index_map -> same block every step -> stays in VMEM.
        return pl.BlockSpec((rows, cols), lambda i: (0, 0))

    out_shape = [jax.ShapeDtypeStruct((B, act_dim), jnp.float32)]
    out_specs = [tile_spec(act_dim)]
    if return_h:
        out_shape.append(jax.ShapeDtypeStruct((B, h2_dim), h_dtype))
        out_specs.append(tile_spec(h2_dim))

    flops = 2 * B * (obs_dim * h1_dim + h1_dim * h2_dim + h2_dim * act_dim)
    weight_args = (w1, b1, w2, b2, wm, bm)
    bytes_accessed = int(
        obs.size * obs.dtype.itemsize
        + sum(a.size * a.dtype.itemsize for a in weight_args)
        + sum(int(np.prod(s.shape)) * jnp.dtype(s.dtype).itemsize
              for s in out_shape)
    )

    outs = pl.pallas_call(
        functools.partial(_policy_fwd_kernel, return_h=return_h),
        out_shape=tuple(out_shape),
        grid=grid,
        in_specs=[
            tile_spec(obs_dim),                # obs batch tile
            resident_spec(obs_dim, h1_dim),    # w1
            resident_spec(1, h1_dim),          # b1 (f32)
            resident_spec(h1_dim, h2_dim),     # w2
            resident_spec(1, h2_dim),          # b2 (f32)
            resident_spec(h2_dim, act_dim),    # wm
            resident_spec(1, act_dim),         # bm (f32)
        ],
        out_specs=tuple(out_specs),
        compiler_params=pltpu.CompilerParams(
            dimension_semantics=("parallel",),     # both TCs on v7x
        ),
        cost_estimate=pl.CostEstimate(
            flops=flops, transcendentals=0, bytes_accessed=bytes_accessed),
    )(obs, *weight_args)

    mean = outs[0]
    h = outs[1] if return_h else None
    if orig_B != B:                     # only the B < 8 corner case
        mean = mean[:orig_B]
        if return_h:
            h = h[:orig_B]

    # std is state-independent; plain XLA exp on act_dim elements is noise.
    std = jnp.exp(log_std)
    if return_h:
        return mean, std, h
    return mean, std


# --------------------------------------------------------------------------
# Deterministic parameter init (PyTorch-Linear-style uniform bounds).
# --------------------------------------------------------------------------
def init_params(key, obs_dim, act_dim, hidden_sizes=(256, 256)):
    def linear(key, fan_in, fan_out):
        kw, kb = jax.random.split(key)
        bound = 1.0 / np.sqrt(fan_in)
        w = jax.random.uniform(kw, (fan_in, fan_out), jnp.float32, -bound, bound)
        b = jax.random.uniform(kb, (1, fan_out), jnp.float32, -bound, bound)
        return w, b

    k1, k2, k3 = jax.random.split(key, 3)
    h1, h2 = hidden_sizes
    w1, b1 = linear(k1, obs_dim, h1)
    w2, b2 = linear(k2, h1, h2)
    wm, bm = linear(k3, h2, act_dim)
    log_std = jnp.zeros((act_dim,), jnp.float32)   # nn.Parameter(torch.zeros(act_dim))
    return dict(w1=w1, b1=b1, w2=w2, b2=b2, wm=wm, bm=bm, log_std=log_std)


def _reference_forward(obs, p):
    h = jnp.maximum(obs @ p["w1"] + p["b1"], 0.0)
    h = jnp.maximum(h @ p["w2"] + p["b2"], 0.0)
    mean = h @ p["wm"] + p["bm"]
    std = jnp.exp(p["log_std"])
    return mean, std, h


if __name__ == "__main__":
    key = jax.random.PRNGKey(0)
    k_param, k_obs, k_obs2 = jax.random.split(key, 3)

    obs_dim, act_dim = 16, 4
    hidden_sizes = (256, 256)

    params = init_params(k_param, obs_dim, act_dim, hidden_sizes)

    # --- small batch, f32 weights: tight correctness vs. XLA reference ---
    obs = jax.random.normal(k_obs, (8, obs_dim), jnp.float32)
    mean, std, h = gaussian_policy_forward(obs, params, weights_dtype=jnp.float32)
    jax.block_until_ready((mean, std, h))

    mean_r, std_r, h_r = _reference_forward(obs, params)
    np.testing.assert_allclose(np.asarray(mean), np.asarray(mean_r), rtol=1e-5, atol=1e-5)
    np.testing.assert_allclose(np.asarray(std), np.asarray(std_r), rtol=1e-6, atol=1e-6)
    np.testing.assert_allclose(np.asarray(h), np.asarray(h_r), rtol=1e-5, atol=1e-5)

    # --- larger batch, default bf16 MXU operands, multi-step ragged grid ---
    obs2 = jax.random.normal(k_obs2, (600, obs_dim), jnp.float32)
    mean2, std2, h2 = gaussian_policy_forward(obs2, params, block_rows=256)
    jax.block_until_ready((mean2, std2, h2))

    mean2_r, std2_r, h2_r = _reference_forward(obs2, params)
    assert mean2.shape == (600, act_dim) and h2.shape == (600, hidden_sizes[1])
    np.testing.assert_allclose(np.asarray(mean2), np.asarray(mean2_r), rtol=5e-2, atol=5e-2)
    np.testing.assert_allclose(np.asarray(h2), np.asarray(h2_r), rtol=5e-2, atol=5e-2)
    np.testing.assert_allclose(np.asarray(std2), np.asarray(std2_r), rtol=1e-6, atol=1e-6)

    # --- distribution-only path (no h writeback), forced 2-step grid (v7x) ---
    mean3, std3 = gaussian_policy_forward(obs2, params, return_h=False,
                                          min_grid_steps=2)
    jax.block_until_ready((mean3, std3))
    np.testing.assert_allclose(np.asarray(mean3), np.asarray(mean2_r), rtol=5e-2, atol=5e-2)

    print("KERNEL_OK")
</pallas_src>

<mosaic_0001>
module attributes {stable_mosaic.version = 11 : i64} {
  func.func @_policy_fwd_kernel(%arg0: i32, %arg1: memref<8x16xf32, #tpu.memory_space<vmem>>, %arg2: memref<16x256xf32, #tpu.memory_space<vmem>>, %arg3: memref<1x256xf32, #tpu.memory_space<vmem>>, %arg4: memref<256x256xf32, #tpu.memory_space<vmem>>, %arg5: memref<1x256xf32, #tpu.memory_space<vmem>>, %arg6: memref<256x4xf32, #tpu.memory_space<vmem>>, %arg7: memref<1x4xf32, #tpu.memory_space<vmem>>, %arg8: memref<8x4xf32, #tpu.memory_space<vmem>>, %arg9: memref<8x256xf32, #tpu.memory_space<vmem>>) attributes {dimension_semantics = [#tpu.dimension_semantics<parallel>], iteration_bounds = array<i64: 1>, scalar_prefetch = 0 : i64, scratch_operands = 0 : i64, tpu.core_type = #tpu.core_type<tc>, window_params = [{transform_indices = @transform_0, window_bounds = array<i64: 8, 16>}, {pipeline_mode = #tpu.pipeline_mode<synchronous>, transform_indices = @transform_1, window_bounds = array<i64: 16, 256>}, {pipeline_mode = #tpu.pipeline_mode<synchronous>, transform_indices = @transform_2, window_bounds = array<i64: 1, 256>}, {pipeline_mode = #tpu.pipeline_mode<synchronous>, transform_indices = @transform_3, window_bounds = array<i64: 256, 256>}, {pipeline_mode = #tpu.pipeline_mode<synchronous>, transform_indices = @transform_4, window_bounds = array<i64: 1, 256>}, {pipeline_mode = #tpu.pipeline_mode<synchronous>, transform_indices = @transform_5, window_bounds = array<i64: 256, 4>}, {pipeline_mode = #tpu.pipeline_mode<synchronous>, transform_indices = @transform_6, window_bounds = array<i64: 1, 4>}, {transform_indices = @transform_7, window_bounds = array<i64: 8, 4>}, {transform_indices = @transform_8, window_bounds = array<i64: 8, 256>}]} {
    %c0 = arith.constant 0 : index
    %c0_0 = arith.constant 0 : index
    %0 = vector.load %arg1[%c0, %c0_0] : memref<8x16xf32, #tpu.memory_space<vmem>>, vector<8x16xf32>
    %c0_1 = arith.constant 0 : index
    %c0_2 = arith.constant 0 : index
    %1 = vector.load %arg2[%c0_1, %c0_2] : memref<16x256xf32, #tpu.memory_space<vmem>>, vector<16x256xf32>
    %cst = arith.constant dense<0.000000e+00> : vector<8x256xf32>
    %2 = tpu.matmul %0, %1, %cst {dimension_numbers = #tpu.dot_dimension_numbers<[1], [0], [0], [1], [0, 0, 1, 1], [], []>} : vector<8x16xf32>, vector<16x256xf32>, vector<8x256xf32> -> vector<8x256xf32>
    %c0_3 = arith.constant 0 : index
    %c0_4 = arith.constant 0 : index
    %3 = vector.load %arg3[%c0_3, %c0_4] : memref<1x256xf32, #tpu.memory_space<vmem>>, vector<1x256xf32>
    %4 = vector.broadcast %3 : vector<1x256xf32> to vector<8x256xf32>
    %5 = arith.addf %2, %4 : vector<8x256xf32>
    %cst_5 = arith.constant 0.000000e+00 : f32
    %6 = vector.broadcast %cst_5 : f32 to vector<8x256xf32>
    %7 = arith.maximumf %5, %6 : vector<8x256xf32>
    %c0_6 = arith.constant 0 : index
    %c0_7 = arith.constant 0 : index
    %8 = vector.load %arg4[%c0_6, %c0_7] : memref<256x256xf32, #tpu.memory_space<vmem>>, vector<256x256xf32>
    %cst_8 = arith.constant dense<0.000000e+00> : vector<8x256xf32>
    %9 = tpu.matmul %7, %8, %cst_8 {dimension_numbers = #tpu.dot_dimension_numbers<[1], [0], [0], [1], [0, 0, 1, 1], [], []>} : vector<8x256xf32>, vector<256x256xf32>, vector<8x256xf32> -> vector<8x256xf32>
    %c0_9 = arith.constant 0 : index
    %c0_10 = arith.constant 0 : index
    %10 = vector.load %arg5[%c0_9, %c0_10] : memref<1x256xf32, #tpu.memory_space<vmem>>, vector<1x256xf32>
    %11 = vector.broadcast %10 : vector<1x256xf32> to vector<8x256xf32>
    %12 = arith.addf %9, %11 : vector<8x256xf32>
    %cst_11 = arith.constant 0.000000e+00 : f32
    %13 = vector.broadcast %cst_11 : f32 to vector<8x256xf32>
    %14 = arith.maximumf %12, %13 : vector<8x256xf32>
    %c0_12 = arith.constant 0 : index
    %c0_13 = arith.constant 0 : index
    %15 = vector.load %arg9[%c0_12, %c0_13] : memref<8x256xf32, #tpu.memory_space<vmem>>, vector<8x256xf32>
    tpu.vector_store %arg9[%c0_12, %c0_13], %14 {strides = array<i32>} : memref<8x256xf32, #tpu.memory_space<vmem>>, vector<8x256xf32>,
    %c0_14 = arith.constant 0 : index
    %c0_15 = arith.constant 0 : index
    %16 = vector.load %arg6[%c0_14, %c0_15] : memref<256x4xf32, #tpu.memory_space<vmem>>, vector<256x4xf32>
    %cst_16 = arith.constant dense<0.000000e+00> : vector<8x4xf32>
    %17 = tpu.matmul %14, %16, %cst_16 {dimension_numbers = #tpu.dot_dimension_numbers<[1], [0], [0], [1], [0, 0, 1, 1], [], []>} : vector<8x256xf32>, vector<256x4xf32>, vector<8x4xf32> -> vector<8x4xf32>
    %c0_17 = arith.constant 0 : index
    %c0_18 = arith.constant 0 : index
    %18 = vector.load %arg7[%c0_17, %c0_18] : memref<1x4xf32, #tpu.memory_space<vmem>>, vector<1x4xf32>
    %19 = vector.broadcast %18 : vector<1x4xf32> to vector<8x4xf32>
    %20 = arith.addf %17, %19 : vector<8x4xf32>
    %c0_19 = arith.constant 0 : index
    %c0_20 = arith.constant 0 : index
    %21 = vector.load %arg8[%c0_19, %c0_20] : memref<8x4xf32, #tpu.memory_space<vmem>>, vector<8x4xf32>
    tpu.vector_store %arg8[%c0_19, %c0_20], %20 {strides = array<i32>} : memref<8x4xf32, #tpu.memory_space<vmem>>, vector<8x4xf32>,
    return
  }
  func.func @transform_0(%arg0: i32) -> (i32, i32) {
    %c0_i32 = arith.constant 0 : i32
    %c0_i32_0 = arith.constant 0 : i32
    return %arg0, %c0_i32 : i32, i32
  }
  func.func @transform_1(%arg0: i32) -> (i32, i32) {
    %c0_i32 = arith.constant 0 : i32
    %c0_i32_0 = arith.constant 0 : i32
    %c0_i32_1 = arith.constant 0 : i32
    return %c0_i32, %c0_i32_0 : i32, i32
  }
  func.func @transform_2(%arg0: i32) -> (i32, i32) {
    %c0_i32 = arith.constant 0 : i32
    %c0_i32_0 = arith.constant 0 : i32
    %c0_i32_1 = arith.constant 0 : i32
    return %c0_i32, %c0_i32_0 : i32, i32
  }
  func.func @transform_3(%arg0: i32) -> (i32, i32) {
    %c0_i32 = arith.constant 0 : i32
    %c0_i32_0 = arith.constant 0 : i32
    %c0_i32_1 = arith.constant 0 : i32
    return %c0_i32, %c0_i32_0 : i32, i32
  }
  func.func @transform_4(%arg0: i32) -> (i32, i32) {
    %c0_i32 = arith.constant 0 : i32
    %c0_i32_0 = arith.constant 0 : i32
    %c0_i32_1 = arith.constant 0 : i32
    return %c0_i32, %c0_i32_0 : i32, i32
  }
  func.func @transform_5(%arg0: i32) -> (i32, i32) {
    %c0_i32 = arith.constant 0 : i32
    %c0_i32_0 = arith.constant 0 : i32
    %c0_i32_1 = arith.constant 0 : i32
    return %c0_i32, %c0_i32_0 : i32, i32
  }
  func.func @transform_6(%arg0: i32) -> (i32, i32) {
    %c0_i32 = arith.constant 0 : i32
    %c0_i32_0 = arith.constant 0 : i32
    %c0_i32_1 = arith.constant 0 : i32
    return %c0_i32, %c0_i32_0 : i32, i32
  }
  func.func @transform_7(%arg0: i32) -> (i32, i32) {
    %c0_i32 = arith.constant 0 : i32
    %c0_i32_0 = arith.constant 0 : i32
    return %arg0, %c0_i32 : i32, i32
  }
  func.func @transform_8(%arg0: i32) -> (i32, i32) {
    %c0_i32 = arith.constant 0 : i32
    %c0_i32_0 = arith.constant 0 : i32
    return %arg0, %c0_i32 : i32, i32
  }
}

</mosaic_0001>

<bundles_post_ra>
// kernel: tpu_custom_call.1
= control target key start
LH: loop header
LB: loop body
LE: loop exit
PB: predicated region body
PF: predicated region fallthrough
CT: control target
= control target key end

     0   :  { %14 = vsyncpa [#allocation3], 0  ;;  %s592_s0 = inlined_call_operand.vmem [shape: f32[8,16], index: 0, kind: input, shape index: {}]   ;;  %s593_s1 = inlined_call_operand.vmem [shape: f32[16,256], index: 1, kind: input, shape index: {}]   ;;  %s594_s2 = inlined_call_operand.vmem [shape: f32[1,256], index: 2, kind: input, shape index: {}]   ;;  %s595_s3 = inlined_call_operand.hbm [shape: f32[256,256], index: 3, kind: input, shape index: {}]   ;;  %s596_s4 = inlined_call_operand.vmem [shape: f32[1,256], index: 4, kind: input, shape index: {}]   ;;  %s597_s5 = inlined_call_operand.vmem [shape: f32[256,4], index: 5, kind: input, shape index: {}]   ;;  %s598_s6 = inlined_call_operand.vmem [shape: f32[1,4], index: 6, kind: input, shape index: {}]   ;;  %s599_s7 = inlined_call_operand.vmem [shape: f32[8,4], index: 7, kind: output, shape index: {0}]   ;;  %s600_s8 = inlined_call_operand.hbm [shape: f32[8,256], index: 8, kind: output, shape index: {1}]  }
   0x1   :  { %15 = vsyncpa [#allocation4], 0  ;;  %s26_s29 = sshll.u32 %s595_s3, 4  ;;  %s414_s30 = smov [#allocation2]   ;;  %s27_s29 = int_to_ptr.hbm [resolvable:$true] %s26_s29 }
   0x2   :  { %s28_s9 = sshll.u32 %s414_s30, 4  ;;  %s415_s10 = smov 256   ;;  %s29_s9 = int_to_ptr.vmem [resolvable:$true] %s28_s9 }
   0x3   :  { %s416_s11 = smov 16  }
   0x4   :  { %34 = dma.hbm_to_vmem [thread:$0]  %s27_s29, 8192, %s29_s9, [#allocation3], %s415_s10, %s415_s10, %s416_s11  }
   0x5   :  { %410 = dma.done.wait [#allocation3], 8192  }
   0x6   :  { %411 = vsyncadd [#allocation3], 4294959104  ;;  %v48_v0 = vld [vmem:[%s593_s1 + $0x10] sm:$0xff]  ;;  %v46_v1 = vld [vmem:[%s593_s1] sm:$0xff]  ;;  %vm56_vm0 = vcmask 130048   ;;  %s343_s16 = sshll.u32 %s600_s8, 4  ;;  %s344_s16 = int_to_ptr.hbm [resolvable:$true] %s343_s16 }
   0x7   :  { %v49_v2 = vld [vmem:[%s593_s1 + $0x18] sm:$0xff]  ;;  %74 = vmatpush.msra.mxu0 %v48_v0  ;;  %v45_v3 = vld [vmem:[%s592_s0] sm:$0xff]  ;;  %v47_v4 = vld [vmem:[%s593_s1 + $0x8] sm:$0xff]  ;;  %vm332_vm1 = vcmask 31744  }
   0x8   :  { %94 = vmatpush.msra.mxu1 %v49_v2  ;;  %v132_v5 = vld [vmem:[#allocation2 + $0xf0] sm:$0xff]  ;;  %v133_v6 = vld [vmem:[#allocation2 + $0xf8] sm:$0xff]  ;;  %v130_v7 = vld [vmem:[#allocation2 + $0xe0] sm:$0xff] }
   0x9   :  { %172 = vmatpush.msra.mxu2 %v132_v5  ;;  %75 = vmatpush.msra.mxu0 %v46_v1  ;;  %v164_v8 = vld [vmem:[#allocation2 + $0x1f0] sm:$0xff]  ;;  %v165_v9 = vld [vmem:[#allocation2 + $0x1f8] sm:$0xff]  ;;  %v131_v10 = vld [vmem:[#allocation2 + $0xe8] sm:$0xff] }
   0xa   :  { %95 = vmatpush.msra.mxu1 %v47_v4  ;;  %355 = vmatmul.msk.f32.vlgmr.msra.gmra.mxu0 %vm56_vm0, %v45_v3  ;;  %v128_v11 = vld [vmem:[#allocation2 + $0xd0] sm:$0xff]  ;;  %v162_v12 = vld [vmem:[#allocation2 + $0x1e0] sm:$0xff]  ;;  %v163_v13 = vld [vmem:[#allocation2 + $0x1e8] sm:$0xff] }
   0xb   :  { %356 = vmatmul.msk.f32.vlgmr.msra.gmra.mxu1 %vm56_vm0, %v45_v3  ;;  %212 = vmatpush.msrb.mxu0 %v133_v6  ;;  %v129_v14 = vld [vmem:[#allocation2 + $0xd8] sm:$0xff]  ;;  %v126_v15 = vld [vmem:[#allocation2 + $0xc0] sm:$0xff]  ;;  %v160_v16 = vld [vmem:[#allocation2 + $0x1d0] sm:$0xff] }
   0xc   :  { %173 = vmatpush.msra.mxu2 %v130_v7  ;;  %192 = vmatpush.msra.mxu3 %v164_v8  ;;  %v161_v17 = vld [vmem:[#allocation2 + $0x1d8] sm:$0xff]  ;;  %v127_v18 = vld [vmem:[#allocation2 + $0xc8] sm:$0xff]  ;;  %v124_v19 = vld [vmem:[#allocation2 + $0xb0] sm:$0xff] }
   0xd   :  { %232 = vmatpush.msrb.mxu1 %v165_v9  ;;  %213 = vmatpush.msrb.mxu0 %v131_v10  ;;  %v158_v20 = vld [vmem:[#allocation2 + $0x1c0] sm:$0xff]  ;;  %v159_v21 = vld [vmem:[#allocation2 + $0x1c8] sm:$0xff]  ;;  %v125_v22 = vld [vmem:[#allocation2 + $0xb8] sm:$0xff] }
   0xe   :  { %174 = vmatpush.msra.mxu2 %v128_v11  ;;  %193 = vmatpush.msra.mxu3 %v162_v12  ;;  %v122_v23 = vld [vmem:[#allocation2 + $0xa0] sm:$0xff]  ;;  %v156_v24 = vld [vmem:[#allocation2 + $0x1b0] sm:$0xff]  ;;  %v157_v25 = vld [vmem:[#allocation2 + $0x1b8] sm:$0xff] }
   0xf   :  { %233 = vmatpush.msrb.mxu1 %v163_v13  ;;  %214 = vmatpush.msrb.mxu0 %v129_v14  ;;  %v123_v26 = vld [vmem:[#allocation2 + $0xa8] sm:$0xff]  ;;  %v120_v27 = vld [vmem:[#allocation2 + $0x90] sm:$0xff]  ;;  %v154_v28 = vld [vmem:[#allocation2 + $0x1a0] sm:$0xff] }
  0x10   :  { %175 = vmatpush.msra.mxu2 %v126_v15  ;;  %194 = vmatpush.msra.mxu3 %v160_v16  ;;  %v155_v29 = vld [vmem:[#allocation2 + $0x1a8] sm:$0xff]  ;;  %v121_v30 = vld [vmem:[#allocation2 + $0x98] sm:$0xff]  ;;  %v118_v31 = vld [vmem:[#allocation2 + $0x80] sm:$0xff] }
  0x11   :  { %234 = vmatpush.msrb.mxu1 %v161_v17  ;;  %215 = vmatpush.msrb.mxu0 %v127_v18  ;;  %v152_v32 = vld [vmem:[#allocation2 + $0x190] sm:$0xff]  ;;  %v153_v33 = vld [vmem:[#allocation2 + $0x198] sm:$0xff]  ;;  %v119_v34 = vld [vmem:[#allocation2 + $0x88] sm:$0xff] }
  0x12   :  { %176 = vmatpush.msra.mxu2 %v124_v19  ;;  %195 = vmatpush.msra.mxu3 %v158_v20  ;;  %v116_v35 = vld [vmem:[#allocation2 + $0x70] sm:$0xff]  ;;  %v150_v36 = vld [vmem:[#allocation2 + $0x180] sm:$0xff]  ;;  %v151_v37 = vld [vmem:[#allocation2 + $0x188] sm:$0xff] }
  0x13   :  { %235 = vmatpush.msrb.mxu1 %v159_v21  ;;  %216 = vmatpush.msrb.mxu0 %v125_v22  ;;  %v117_v38 = vld [vmem:[#allocation2 + $0x78] sm:$0xff]  ;;  %v114_v39 = vld [vmem:[#allocation2 + $0x60] sm:$0xff]  ;;  %v148_v40 = vld [vmem:[#allocation2 + $0x170] sm:$0xff] }
  0x14   :  { %177 = vmatpush.msra.mxu2 %v122_v23  ;;  %196 = vmatpush.msra.mxu3 %v156_v24  ;;  %v149_v41 = vld [vmem:[#allocation2 + $0x178] sm:$0xff]  ;;  %v115_v42 = vld [vmem:[#allocation2 + $0x68] sm:$0xff]  ;;  %v112_v43 = vld [vmem:[#allocation2 + $0x50] sm:$0xff] }
  0x15   :  { %236 = vmatpush.msrb.mxu1 %v157_v25  ;;  %217 = vmatpush.msrb.mxu0 %v123_v26  ;;  %v146_v44 = vld [vmem:[#allocation2 + $0x160] sm:$0xff]  ;;  %v147_v45 = vld [vmem:[#allocation2 + $0x168] sm:$0xff]  ;;  %v113_v46 = vld [vmem:[#allocation2 + $0x58] sm:$0xff] }
  0x16   :  { %178 = vmatpush.msra.mxu2 %v120_v27  ;;  %197 = vmatpush.msra.mxu3 %v154_v28  ;;  %v110_v47 = vld [vmem:[#allocation2 + $0x40] sm:$0xff]  ;;  %v144_v48 = vld [vmem:[#allocation2 + $0x150] sm:$0xff]  ;;  %v145_v49 = vld [vmem:[#allocation2 + $0x158] sm:$0xff] }
  0x17   :  { %237 = vmatpush.msrb.mxu1 %v155_v29  ;;  %218 = vmatpush.msrb.mxu0 %v121_v30  ;;  %v111_v50 = vld [vmem:[#allocation2 + $0x48] sm:$0xff]  ;;  %v108_v51 = vld [vmem:[#allocation2 + $0x30] sm:$0xff]  ;;  %v142_v52 = vld [vmem:[#allocation2 + $0x140] sm:$0xff] }
  0x18   :  { %179 = vmatpush.msra.mxu2 %v118_v31  ;;  %198 = vmatpush.msra.mxu3 %v152_v32  ;;  %v143_v53 = vld [vmem:[#allocation2 + $0x148] sm:$0xff]  ;;  %v109_v54 = vld [vmem:[#allocation2 + $0x38] sm:$0xff]  ;;  %v106_v55 = vld [vmem:[#allocation2 + $0x20] sm:$0xff] }
  0x19   :  { %238 = vmatpush.msrb.mxu1 %v153_v33  ;;  %219 = vmatpush.msrb.mxu0 %v119_v34  ;;  %v140_v56 = vld [vmem:[#allocation2 + $0x130] sm:$0xff]  ;;  %v107_v57 = vld [vmem:[#allocation2 + $0x28] sm:$0xff]  ;;  %v141_v58 = vld [vmem:[#allocation2 + $0x138] sm:$0xff] }
  0x1a   :  { %180 = vmatpush.msra.mxu2 %v116_v35  ;;  %199 = vmatpush.msra.mxu3 %v150_v36  ;;  %v104_v59 = vld [vmem:[#allocation2 + $0x10] sm:$0xff]  ;;  %v138_v60 = vld [vmem:[#allocation2 + $0x120] sm:$0xff]  ;;  %v105_v61 = vld [vmem:[#allocation2 + $0x18] sm:$0xff] }
  0x1b   :  { %239 = vmatpush.msrb.mxu1 %v151_v37  ;;  %220 = vmatpush.msrb.mxu0 %v117_v38  ;;  %v139_v62 = vld [vmem:[#allocation2 + $0x128] sm:$0xff]  ;;  %v102_v63 = vld [vmem:[#allocation2] sm:$0xff]  ;;  %v136_v0 = vld [vmem:[#allocation2 + $0x110] sm:$0xff] }
  0x1c   :  { %181 = vmatpush.msra.mxu2 %v114_v39  ;;  %200 = vmatpush.msra.mxu3 %v148_v40  ;;  %v103_v1 = vld [vmem:[#allocation2 + $0x8] sm:$0xff]  ;;  %v137_v2 = vld [vmem:[#allocation2 + $0x118] sm:$0xff]  ;;  %v134_v3 = vld [vmem:[#allocation2 + $0x100] sm:$0xff] }
  0x1d   :  { %240 = vmatpush.msrb.mxu1 %v149_v41  ;;  %221 = vmatpush.msrb.mxu0 %v115_v42  ;;  %v135_v4 = vld [vmem:[#allocation2 + $0x108] sm:$0xff]  ;;  %v287_v5 = vld [vmem:[%s597_s5 + $0xf8] sm:$0xff]  ;;  %v286_v6 = vld [vmem:[%s597_s5 + $0xf0] sm:$0xff] }
  0x1e   :  { %182 = vmatpush.msra.mxu2 %v112_v43  ;;  %201 = vmatpush.msra.mxu3 %v146_v44  ;;  %v271_v7 = vld [vmem:[%s597_s5 + $0x78] sm:$0xff]  ;;  %v270_v8 = vld [vmem:[%s597_s5 + $0x70] sm:$0xff]  ;;  %v285_v9 = vld [vmem:[%s597_s5 + $0xe8] sm:$0xff] }
  0x1f   :  { %241 = vmatpush.msrb.mxu1 %v147_v45  ;;  %222 = vmatpush.msrb.mxu0 %v113_v46  ;;  %v269_v10 = vld [vmem:[%s597_s5 + $0x68] sm:$0xff]  ;;  %v284_v11 = vld [vmem:[%s597_s5 + $0xe0] sm:$0xff]  ;;  %v283_v13 = vld [vmem:[%s597_s5 + $0xd8] sm:$0xff] }
  0x20   :  { %183 = vmatpush.msra.mxu2 %v110_v47  ;;  %202 = vmatpush.msra.mxu3 %v144_v48  ;;  %v268_v12 = vld [vmem:[%s597_s5 + $0x60] sm:$0xff]  ;;  %v267_v14 = vld [vmem:[%s597_s5 + $0x58] sm:$0xff]  ;;  %v282_v15 = vld [vmem:[%s597_s5 + $0xd0] sm:$0xff] }
  0x21   :  { %242 = vmatpush.msrb.mxu1 %v145_v49  ;;  %223 = vmatpush.msrb.mxu0 %v111_v50  ;;  %v266_v16 = vld [vmem:[%s597_s5 + $0x50] sm:$0xff]  ;;  %v281_v17 = vld [vmem:[%s597_s5 + $0xc8] sm:$0xff]  ;;  %v280_v19 = vld [vmem:[%s597_s5 + $0xc0] sm:$0xff] }
  0x22   :  { %184 = vmatpush.msra.mxu2 %v108_v51  ;;  %203 = vmatpush.msra.mxu3 %v142_v52  ;;  %v265_v18 = vld [vmem:[%s597_s5 + $0x48] sm:$0xff]  ;;  %v264_v20 = vld [vmem:[%s597_s5 + $0x40] sm:$0xff]  ;;  %v279_v21 = vld [vmem:[%s597_s5 + $0xb8] sm:$0xff] }
  0x23   :  { %243 = vmatpush.msrb.mxu1 %v143_v53  ;;  %224 = vmatpush.msrb.mxu0 %v109_v54  ;;  %v263_v22 = vld [vmem:[%s597_s5 + $0x38] sm:$0xff]  ;;  %v278_v23 = vld [vmem:[%s597_s5 + $0xb0] sm:$0xff]  ;;  %v277_v24 = vld [vmem:[%s597_s5 + $0xa8] sm:$0xff] }
  0x24   :  { %185 = vmatpush.msra.mxu2 %v106_v55  ;;  %204 = vmatpush.msra.mxu3 %v140_v56  ;;  %v50_v25 = vld [vmem:[%s594_s2] sm:$0x3]  ;;  %v262_v35 = vld [vmem:[%s597_s5 + $0x30] sm:$0xff]  ;;  %v275_v36 = vld [vmem:[%s597_s5 + $0x98] sm:$0xff] }
  0x25   :  { %225 = vmatpush.msrb.mxu0 %v107_v57  ;;  %244 = vmatpush.msrb.mxu1 %v141_v58  ;;  %v276_v26 = vld [vmem:[%s597_s5 + $0xa0] sm:$0xff]  ;;  %v52_v27 = vperm.slane %v50_v25, 0  ;;  %v53_v28 = vperm.slane %v50_v25, 1  ;;  %v261_v37 = vld [vmem:[%s597_s5 + $0x28] sm:$0xff]  ;;  %v274_v38 = vld [vmem:[%s597_s5 + $0x90] sm:$0xff] }
  0x26   :  { %186 = vmatpush.msra.mxu2 %v104_v59  ;;  %205 = vmatpush.msra.mxu3 %v138_v60  ;;  %v260_v39 = vld [vmem:[%s597_s5 + $0x20] sm:$0xff]  ;;  %v273_v40 = vld [vmem:[%s597_s5 + $0x88] sm:$0xff]  ;;  %v259_v41 = vld [vmem:[%s597_s5 + $0x18] sm:$0xff] }
  0x27   :  { %226 = vmatpush.msrb.mxu0 %v105_v61  ;;  %245 = vmatpush.msrb.mxu1 %v139_v62  ;;  %v272_v42 = vld [vmem:[%s597_s5 + $0x80] sm:$0xff]  ;;  %v258_v43 = vld [vmem:[%s597_s5 + $0x10] sm:$0xff]  ;;  %v257_v44 = vld [vmem:[%s597_s5 + $0x8] sm:$0xff] }
  0x28   :  { %187 = vmatpush.msra.mxu2 %v102_v63  ;;  %206 = vmatpush.msra.mxu3 %v136_v0  ;;  %v256_v45 = vld [vmem:[%s597_s5] sm:$0xff]  ;;  %s417_s5 = smov [#allocation5]  }
  0x29   :  { %227 = vmatpush.msrb.mxu0 %v103_v1  ;;  %246 = vmatpush.msrb.mxu1 %v137_v2  ;;  %v166_v46 = vld [vmem:[%s596_s4] sm:$0x3]  ;;  %s341_s14 = sshll.u32 %s417_s5, 4  ;;  %s342_s14 = int_to_ptr.vmem [resolvable:$true] %s341_s14 }
  0x2a   :  { %207 = vmatpush.msra.mxu3 %v134_v3  ;;  %292 = vmatpush.msrb.mxu2 %v271_v7  ;;  %v169_v47 = vperm.slane %v166_v46, 1  ;;  %v168_v52 = vperm.slane %v166_v46, 0  ;;  %v361_v59 = vld [vmem:[%s598_s6] ss:$0 sm:$0xff] }
  0x2b   :  { %247 = vmatpush.msrb.mxu1 %v135_v4 }
  0x2c   :  { %312 = vmatpush.msrb.mxu3 %v287_v5  ;;  %293 = vmatpush.msrb.mxu2 %v270_v8 }
  0x2e   :  { %313 = vmatpush.msrb.mxu3 %v286_v6  ;;  %294 = vmatpush.msrb.mxu2 %v269_v10 }
  0x30   :  { %314 = vmatpush.msrb.mxu3 %v285_v9  ;;  %295 = vmatpush.msrb.mxu2 %v268_v12 }
  0x32   :  { %315 = vmatpush.msrb.mxu3 %v284_v11  ;;  %296 = vmatpush.msrb.mxu2 %v267_v14 }
  0x34   :  { %316 = vmatpush.msrb.mxu3 %v283_v13  ;;  %297 = vmatpush.msrb.mxu2 %v266_v16 }
  0x36   :  { %317 = vmatpush.msrb.mxu3 %v282_v15  ;;  %298 = vmatpush.msrb.mxu2 %v265_v18 }
  0x38   :  { %318 = vmatpush.msrb.mxu3 %v281_v17  ;;  %299 = vmatpush.msrb.mxu2 %v264_v20 }
  0x3a   :  { %319 = vmatpush.msrb.mxu3 %v280_v19  ;;  %300 = vmatpush.msrb.mxu2 %v263_v22 }
  0x3c   :  { %320 = vmatpush.msrb.mxu3 %v279_v21  ;;  %301 = vmatpush.msrb.mxu2 %v262_v35 }
  0x3e   :  { %321 = vmatpush.msrb.mxu3 %v278_v23  ;;  %302 = vmatpush.msrb.mxu2 %v261_v37 }
  0x40   :  { %322 = vmatpush.msrb.mxu3 %v277_v24  ;;  %303 = vmatpush.msrb.mxu2 %v260_v39 }
  0x42   :  { %323 = vmatpush.msrb.mxu3 %v276_v26  ;;  %304 = vmatpush.msrb.mxu2 %v259_v41 }
  0x44   :  { %324 = vmatpush.msrb.mxu3 %v275_v36  ;;  %305 = vmatpush.msrb.mxu2 %v258_v43 }
  0x46   :  { %325 = vmatpush.msrb.mxu3 %v274_v38  ;;  %306 = vmatpush.msrb.mxu2 %v257_v44 }
  0x48   :  { %326 = vmatpush.msrb.mxu3 %v273_v40  ;;  %307 = vmatpush.msrb.mxu2 %v256_v45 }
  0x4a   :  { %327 = vmatpush.msrb.mxu3 %v272_v42 }
  0x87   :  { %v77_v29 = vpop.f32.mrf.mxu0 }
  0x88   :  { %v97_v30 = vpop.f32.mrf.mxu1  ;;  %v78_v31 = vadd.f32 %v77_v29, %v52_v27 }
  0x89   :  { %v98_v32 = vadd.f32 %v97_v30, %v53_v28 }
  0x8a   :  { %v100_v33 = vmax.f32 %v78_v31, 0.0 }
  0x8b   :  { %v101_v34 = vmax.f32 %v98_v32, 0.0 }
  0x8c   :  { %188 = vmatmul.f32.vlgmr.msra.gmra.mxu2 %v100_v33  ;;  %228 = vmatmul.f32.vlgmr.msrb.gmra.mxu0 %v100_v33 }
  0x8d   :  { %208 = vmatmul.f32.vlgmr.msra.gmra.mxu3 %v101_v34  ;;  %248 = vmatmul.f32.vlgmr.msrb.gmra.mxu1 %v101_v34 }
 0x109   :  { %v229_v48 = vpop.f32.mrf.mxu0 }
 0x10a   :  { %v230_v49 = vadd.f32 %v229_v48, %v169_v47  ;;  %v249_v50 = vpop.f32.mrf.mxu1 }
 0x10c   :  { %v250_v51 = vadd.f32 %v249_v50, %v230_v49 }
 0x10e   :  { %v253_v53 = vmax.f32 %v250_v51, 0.0 }
 0x10f   :  { %v189_v54 = vpop.f32.mrf.mxu2 }
 0x110   :  { %255 = vst [vmem:[#allocation5 + $0x8] sm:$0xff] %v253_v53  ;;  %v190_v55 = vadd.f32 %v189_v54, %v168_v52  ;;  %328 = vmatmul.f32.vlgmr.msrb.gmra.mxu3 %v253_v53  ;;  %v209_v56 = vpop.f32.mrf.mxu3 }
 0x112   :  { %v210_v57 = vadd.f32 %v209_v56, %v190_v55 }
 0x114   :  { %v252_v58 = vmax.f32 %v210_v57, 0.0 }
 0x116   :  { %254 = vst [vmem:[#allocation5] sm:$0xff] %v252_v58  ;;  %308 = vmatmul.f32.vlgmr.msrb.gmra.mxu2 %v252_v58 }
 0x117   :  { %346 = dma.vmem_to_hbm [thread:$0]  %s342_s14, 256, %s344_s16, [#allocation4]  }
 0x193   :  { %v329_v62 = vpop.f32.mrf.mxu3 }
 0x199   :  { %v309_v60 = vpop.f32.mrf.mxu2 }
 0x19a   :  { %v310_v61 = vadd.f32 %v361_v59, %v309_v60 }
 0x19c   :  { %v330_v63 = vadd.f32 %v329_v62, %v310_v61 }
 0x19e   :  { %333 = vst.msk [vmem:[%s599_s7] sm:$0xff] %vm332_vm1, %v330_v63 }
 0x19f   :  { %412 = dma.done.wait [#allocation4], 256  }
 0x1a0   :  { %413 = vsyncadd [#allocation4], 4294967040 }
 0x1a1   :  { %353 = vsyncpa [#allocation3], 1 }
 0x1a2   :  { %354 = vsyncpa [#allocation4], 1 }

</bundles_post_ra>
